<compile_context>
chip_gen: v6e
topology: v6e:2x2x1
jax: 0.10.0
libtpu: 0.0.40
codegen_flags: <defaults>
</compile_context>

<pallas_src>
import jax
import jax.numpy as jnp
from jax.experimental import pallas as pl
from jax.experimental.pallas import tpu as pltpu


# ----------------------------------------------------------------------------
# Shared tile computation (feature-major, batch on lanes).
#   c_row : [1, TB] f32
#   t, b3 : f32 scalars
#   vp    : [64, 8] f32   col0=w1c col1=w1t col2=b1 col3=b2 col4=w3
#   w2    : [64, 64] f32  (out, in)
# returns [1, TB] f32
# ----------------------------------------------------------------------------
def _mlp_tile(c_row, t, b3, vp, w2):
    w1c = vp[:, 0:1]
    w1t = vp[:, 1:2]
    b1 = vp[:, 2:3]
    b2 = vp[:, 3:4]
    w3 = vp[:, 4:5]

    # Layer 1: Linear(2, 64) + SiLU as a VPU rank-1 update (K=2 -> skip MXU).
    h = w1c * c_row + (w1t * t + b1)                                  # [64, TB]
    h = h * jax.nn.sigmoid(h)                                         # SiLU (EUP)

    # Layer 2: Linear(64, 64) + SiLU — single MXU dot, batch lane-dense.
    h = jnp.dot(w2, h, preferred_element_type=jnp.float32) + b2       # [64, TB]
    h = h * jax.nn.sigmoid(h)

    # Layer 3: Linear(64, 1) as multiply + sublane reduce (N=1 -> skip MXU).
    return jnp.sum(h * w3, axis=0, keepdims=True) + b3                # [1, TB]


def _ode_mlp_kernel(s_ref, c_ref, vp_ref, w2_ref, out_ref):
    # s_ref: (1, 2) SMEM = [t, b3]; c_ref/out_ref: (1, 1, TB); vp: (64,8); w2: (64,64)
    t = s_ref[0, 0]
    b3 = s_ref[0, 1]
    c_row = c_ref[0].astype(jnp.float32)                              # [1, TB]
    y = _mlp_tile(c_row, t, b3,
                  vp_ref[...].astype(jnp.float32),
                  w2_ref[...].astype(jnp.float32))
    out_ref[0] = y.astype(out_ref.dtype)


def _ode_mlp_multi_kernel(s_ref, c_ref, vp_ref, w2_ref, out_ref):
    # s_ref: (2, T) SMEM — row 0 = ts, row 1 = b3 (replicated).
    ti = pl.program_id(1)
    t = s_ref[0, ti]
    b3 = s_ref[1, 0]
    c_row = c_ref[0].astype(jnp.float32)
    y = _mlp_tile(c_row, t, b3,
                  vp_ref[...].astype(jnp.float32),
                  w2_ref[...].astype(jnp.float32))
    out_ref[0, 0] = y.astype(out_ref.dtype)


# ----------------------------------------------------------------------------
# Generation-aware tiling.
# ----------------------------------------------------------------------------
def _tensorcores_per_chip():
    # v7x (and v4/v5p megacore) expose 2 TensorCores to one Pallas grid;
    # v5e/v6e have one.  Failure-proof heuristic.
    try:
        kind = jax.devices()[0].device_kind.lower()
    except Exception:
        return 1
    if any(s in kind for s in ("v7", "7x", "v4", "v5p")):
        return 2
    return 1


def _choose_tiling(B, num_cores):
    """Return (B_pad, block_b).

    - batch padded to a 128-lane multiple -> unmasked lane-dense stores;
    - single-TC (v5e/v6e): prefer G=1, one big tile up to 16K lanes (the grid
      is a serial loop; each extra step is ~0.35 us of pure overhead);
    - dual-TC (v7x): aim for an even grid so 'parallel' puts one big tile per
      core; cap at 8K lanes/tile for v7x's smaller (64 MiB) VMEM.
    """
    cap = 8192 if num_cores >= 2 else 16384
    pad_unit = 256 if (num_cores >= 2 and B > 128) else 128
    B_pad = ((B + pad_unit - 1) // pad_unit) * pad_unit
    want_even_grid = num_cores >= 2 and B_pad >= 256
    best = 128
    d = 128
    while d <= min(B_pad, cap):
        if B_pad % d == 0 and (not want_even_grid or (B_pad // d) % num_cores == 0):
            best = d
        d += 128
    return B_pad, best


def _pad_c(c_t, B, B_pad):
    c_flat = c_t.reshape(B)
    if B_pad != B:
        c_flat = jnp.pad(c_flat, (0, B_pad - B))
    return c_flat


def _cost(B_pad, n_evals=1):
    # Per-element: 2*(2*64) + 2*(64*64) + 2*(64*1) flops; 2 sigmoids x 64 feats.
    return pl.CostEstimate(
        flops=2 * (2 * 64 + 64 * 64 + 64) * B_pad * n_evals,
        transcendentals=2 * 64 * B_pad * n_evals,
        bytes_accessed=4 * B_pad * (1 + n_evals) + (64 * 8 + 64 * 64) * 4,
    )


# ----------------------------------------------------------------------------
# Public wrappers.
# ----------------------------------------------------------------------------
def ode_func_forward(t, y, c_t, params, *, block_b=None):
    """Pallas implementation of ODEFunc.forward(t, y, c_t) -> [B, 1]."""
    del y  # unused, as in the reference module
    B = c_t.shape[0]
    num_cores = _tensorcores_per_chip()
    if block_b is None:
        B_pad, block_b = _choose_tiling(B, num_cores)
    else:
        assert block_b % 128 == 0, "block_b must be a multiple of 128 lanes"
        B_pad = ((B + block_b - 1) // block_b) * block_b
    G = B_pad // block_b
    dtype = c_t.dtype

    # Zero-copy layout plumbing: [B,1] -> [G, 1, block_b] (batch on lanes),
    # zero-padded to a lane multiple.  No t_input / concat materialization.
    c3 = _pad_c(c_t, B, B_pad).reshape(G, 1, block_b)
    scal = jnp.stack([jnp.asarray(t, jnp.float32).reshape(()),
                      jnp.asarray(params["b3"], jnp.float32).reshape(())]
                     ).reshape(1, 2)                                   # SMEM [t, b3]

    out = pl.pallas_call(
        _ode_mlp_kernel,
        out_shape=jax.ShapeDtypeStruct((G, 1, block_b), dtype),
        grid_spec=pltpu.PrefetchScalarGridSpec(
            num_scalar_prefetch=0,
            grid=(G,),
            in_specs=[
                pl.BlockSpec(memory_space=pltpu.MemorySpace.SMEM),      # [t, b3]
                pl.BlockSpec((1, 1, block_b), lambda i: (i, 0, 0)),     # c_t tile
                pl.BlockSpec((64, 8), lambda i: (0, 0)),                # packed vec params
                pl.BlockSpec((64, 64), lambda i: (0, 0)),               # w2
            ],
            out_specs=pl.BlockSpec((1, 1, block_b), lambda i: (i, 0, 0)),
        ),
        compiler_params=pltpu.CompilerParams(
            dimension_semantics=("parallel",)),
        cost_estimate=_cost(B_pad),
    )(scal, c3, params["vp"], params["w2"])

    return out.reshape(B_pad, 1)[:B]


def ode_func_forward_multi(ts, c_t, params, *, block_b=None):
    """Fused solver-stage version: evaluate dy/dt at ALL time points `ts` [T]
    for the same c_t in ONE pallas_call.  Weights stay VMEM-resident across
    the whole (batch-tile x T) grid, amortizing dispatch + the ~17 KB weight
    DMA that dominates a per-step call.  Returns [T, B, 1]."""
    ts = jnp.asarray(ts, jnp.float32).reshape(-1)
    T = int(ts.shape[0])
    B = c_t.shape[0]
    num_cores = _tensorcores_per_chip()
    if block_b is None:
        B_pad, block_b = _choose_tiling(B, num_cores)
    else:
        assert block_b % 128 == 0
        B_pad = ((B + block_b - 1) // block_b) * block_b
    G = B_pad // block_b
    dtype = c_t.dtype

    c3 = _pad_c(c_t, B, B_pad).reshape(G, 1, block_b)
    b3 = jnp.asarray(params["b3"], jnp.float32).reshape(())
    scal = jnp.stack([ts, jnp.full((T,), b3, jnp.float32)], axis=0)     # (2, T) SMEM

    out = pl.pallas_call(
        _ode_mlp_multi_kernel,
        out_shape=jax.ShapeDtypeStruct((T, G, 1, block_b), dtype),
        grid_spec=pltpu.PrefetchScalarGridSpec(
            num_scalar_prefetch=0,
            grid=(G, T),     # t innermost: the c_t tile stays resident across T
            in_specs=[
                pl.BlockSpec(memory_space=pltpu.MemorySpace.SMEM),          # ts / b3
                pl.BlockSpec((1, 1, block_b), lambda g, ti: (g, 0, 0)),     # c_t tile
                pl.BlockSpec((64, 8), lambda g, ti: (0, 0)),                # packed vec params
                pl.BlockSpec((64, 64), lambda g, ti: (0, 0)),               # w2
            ],
            out_specs=pl.BlockSpec((1, 1, 1, block_b),
                                   lambda g, ti: (ti, g, 0, 0)),
        ),
        compiler_params=pltpu.CompilerParams(
            dimension_semantics=("parallel", "arbitrary")),
        cost_estimate=_cost(B_pad, n_evals=T),
    )(scal, c3, params["vp"], params["w2"])

    return out.reshape(T, B_pad)[:, :B].reshape(T, B, 1)


# ----------------------------------------------------------------------------
# Deterministic parameter init (torch.nn.Linear-style U(-1/sqrt(fan_in), ...)),
# stored directly in the kernel's packed, feature-major layout.
# ----------------------------------------------------------------------------
def init_params(key):
    def linear(key, fan_in, fan_out):
        kw, kb = jax.random.split(key)
        bound = 1.0 / float(fan_in) ** 0.5
        w = jax.random.uniform(kw, (fan_out, fan_in), jnp.float32, -bound, bound)
        b = jax.random.uniform(kb, (fan_out,), jnp.float32, -bound, bound)
        return w, b

    k1, k2, k3 = jax.random.split(key, 3)
    w1, b1 = linear(k1, 2, 64)     # [64, 2], [64]
    w2, b2 = linear(k2, 64, 64)    # [64, 64], [64]
    w3, b3 = linear(k3, 64, 1)     # [1, 64], [1]

    # Pack the five per-feature vectors into one [64, 8] array: one DMA and
    # one double-buffer pair instead of five padded (64,1) inputs.
    vp = jnp.zeros((64, 8), jnp.float32)
    vp = vp.at[:, 0].set(w1[:, 0])     # weight column applied to c_t
    vp = vp.at[:, 1].set(w1[:, 1])     # weight column applied to t
    vp = vp.at[:, 2].set(b1)
    vp = vp.at[:, 3].set(b2)
    vp = vp.at[:, 4].set(w3[0, :])
    return {"vp": vp, "w2": w2, "b3": b3[0]}


def _reference(t, c_t, params):
    # Pure-JAX reference (batch-major), mirrors the PyTorch module exactly.
    vp, w2, b3 = params["vp"], params["w2"], params["b3"]
    w1 = vp[:, 0:2]                    # [64, 2] (out, in) ordered [c_t, t]
    b1 = vp[:, 2]
    b2 = vp[:, 3]
    w3 = vp[:, 4:5]                    # [64, 1]
    t_input = jnp.ones_like(c_t) * jnp.asarray(t, c_t.dtype)
    inp = jnp.concatenate([c_t, t_input], axis=1)              # [B, 2]
    h = inp @ w1.T + b1
    h = h * jax.nn.sigmoid(h)
    h = h @ w2.T + b2
    h = h * jax.nn.sigmoid(h)
    return h @ w3 + b3                                          # [B, 1]


if __name__ == "__main__":
    key = jax.random.PRNGKey(0)
    kp, kc = jax.random.split(key)
    params = init_params(kp)
    t = 0.5

    # Small batch (typical ODEFunc usage); padded to 128 lanes internally.
    B = 8
    c_t = jax.random.normal(kc, (B, 1), jnp.float32)
    y = jnp.zeros((B, 1), jnp.float32)      # unused (API parity with PyTorch)
    out = jax.block_until_ready(ode_func_forward(t, y, c_t, params))
    ref = _reference(t, c_t, params)
    assert out.shape == (B, 1)
    assert jnp.allclose(out, ref, atol=1e-5, rtol=1e-5)

    # Larger lane-aligned batch: one big tile on 1-TC chips, even split on 2-TC.
    B2 = 512
    c_t2 = jax.random.normal(kc, (B2, 1), jnp.float32)
    out2 = jax.block_until_ready(ode_func_forward(t, None, c_t2, params))
    ref2 = _reference(t, c_t2, params)
    assert out2.shape == (B2, 1)
    assert jnp.allclose(out2, ref2, atol=1e-5, rtol=1e-5)

    # Fused multi-time-point evaluation (solver-stage fusion): one pallas_call.
    ts = jnp.array([0.0, 0.25, 0.5, 1.0], jnp.float32)
    out3 = jax.block_until_ready(ode_func_forward_multi(ts, c_t2, params))
    assert out3.shape == (ts.shape[0], B2, 1)
    for i in range(ts.shape[0]):
        assert jnp.allclose(out3[i], _reference(ts[i], c_t2, params),
                            atol=1e-5, rtol=1e-5)

    print("KERNEL_OK")
</pallas_src>

<mosaic_0001>
module attributes {stable_mosaic.version = 11 : i64} {
  func.func @_ode_mlp_kernel(%arg0: i32, %arg1: memref<1x2xf32, #tpu.memory_space<smem>>, %arg2: memref<1x1x128xf32, #tpu.memory_space<vmem>>, %arg3: memref<64x8xf32, #tpu.memory_space<vmem>>, %arg4: memref<64x64xf32, #tpu.memory_space<vmem>>, %arg5: memref<1x1x128xf32, #tpu.memory_space<vmem>>) attributes {dimension_semantics = [#tpu.dimension_semantics<parallel>], iteration_bounds = array<i64: 1>, scalar_prefetch = 0 : i64, scratch_operands = 0 : i64, tpu.core_type = #tpu.core_type<tc>, window_params = [{transform_indices = @transform_0, window_bounds = array<i64: 1, 2>}, {transform_indices = @transform_1, window_bounds = array<i64: 1, 1, 128>}, {pipeline_mode = #tpu.pipeline_mode<synchronous>, transform_indices = @transform_2, window_bounds = array<i64: 64, 8>}, {pipeline_mode = #tpu.pipeline_mode<synchronous>, transform_indices = @transform_3, window_bounds = array<i64: 64, 64>}, {transform_indices = @transform_4, window_bounds = array<i64: 1, 1, 128>}]} {
    %c0 = arith.constant 0 : index
    %c0_0 = arith.constant 0 : index
    %0 = memref.load %arg1[%c0, %c0_0] : memref<1x2xf32, #tpu.memory_space<smem>>
    %c0_1 = arith.constant 0 : index
    %c1 = arith.constant 1 : index
    %1 = memref.load %arg1[%c0_1, %c1] : memref<1x2xf32, #tpu.memory_space<smem>>
    %c0_2 = arith.constant 0 : index
    %c0_3 = arith.constant 0 : index
    %c0_4 = arith.constant 0 : index
    %2 = vector.load %arg2[%c0_2, %c0_3, %c0_4] : memref<1x1x128xf32, #tpu.memory_space<vmem>>, vector<1x1x128xf32>
    %3 = vector.shape_cast %2 : vector<1x1x128xf32> to vector<1x128xf32>
    %c0_5 = arith.constant 0 : index
    %c0_6 = arith.constant 0 : index
    %4 = vector.load %arg3[%c0_5, %c0_6] : memref<64x8xf32, #tpu.memory_space<vmem>>, vector<64x8xf32>
    %c0_7 = arith.constant 0 : index
    %c0_8 = arith.constant 0 : index
    %5 = vector.load %arg4[%c0_7, %c0_8] : memref<64x64xf32, #tpu.memory_space<vmem>>, vector<64x64xf32>
    %6 = vector.extract_strided_slice %4 {offsets = [0, 0], sizes = [64, 1], strides = [1, 1]} : vector<64x8xf32> to vector<64x1xf32>
    %7 = vector.extract_strided_slice %4 {offsets = [0, 1], sizes = [64, 1], strides = [1, 1]} : vector<64x8xf32> to vector<64x1xf32>
    %8 = vector.extract_strided_slice %4 {offsets = [0, 2], sizes = [64, 1], strides = [1, 1]} : vector<64x8xf32> to vector<64x1xf32>
    %9 = vector.extract_strided_slice %4 {offsets = [0, 3], sizes = [64, 1], strides = [1, 1]} : vector<64x8xf32> to vector<64x1xf32>
    %10 = vector.extract_strided_slice %4 {offsets = [0, 4], sizes = [64, 1], strides = [1, 1]} : vector<64x8xf32> to vector<64x1xf32>
    %11 = vector.broadcast %6 : vector<64x1xf32> to vector<64x128xf32>
    %12 = vector.broadcast %3 : vector<1x128xf32> to vector<64x128xf32>
    %13 = arith.mulf %11, %12 : vector<64x128xf32>
    %14 = vector.broadcast %0 : f32 to vector<64x1xf32>
    %15 = arith.mulf %7, %14 : vector<64x1xf32>
    %16 = arith.addf %15, %8 : vector<64x1xf32>
    %17 = vector.broadcast %16 : vector<64x1xf32> to vector<64x128xf32>
    %18 = arith.addf %13, %17 : vector<64x128xf32>
    %19 = arith.negf %18 : vector<64x128xf32>
    %20 = math.exp %19 : vector<64x128xf32>
    %cst = arith.constant 1.000000e+00 : f32
    %21 = vector.broadcast %cst : f32 to vector<64x128xf32>
    %22 = arith.addf %21, %20 : vector<64x128xf32>
    %23 = arith.divf %21, %22 : vector<64x128xf32>
    %24 = arith.mulf %18, %23 : vector<64x128xf32>
    %cst_9 = arith.constant dense<0.000000e+00> : vector<64x128xf32>
    %25 = tpu.matmul %5, %24, %cst_9 {dimension_numbers = #tpu.dot_dimension_numbers<[1], [0], [0], [1], [0, 0, 1, 1], [], []>} : vector<64x64xf32>, vector<64x128xf32>, vector<64x128xf32> -> vector<64x128xf32>
    %26 = vector.broadcast %9 : vector<64x1xf32> to vector<64x128xf32>
    %27 = arith.addf %25, %26 : vector<64x128xf32>
    %28 = arith.negf %27 : vector<64x128xf32>
    %29 = math.exp %28 : vector<64x128xf32>
    %cst_10 = arith.constant 1.000000e+00 : f32
    %30 = vector.broadcast %cst_10 : f32 to vector<64x128xf32>
    %31 = arith.addf %30, %29 : vector<64x128xf32>
    %32 = arith.divf %30, %31 : vector<64x128xf32>
    %33 = arith.mulf %27, %32 : vector<64x128xf32>
    %34 = vector.broadcast %10 : vector<64x1xf32> to vector<64x128xf32>
    %35 = arith.mulf %33, %34 : vector<64x128xf32>
    %cst_11 = arith.constant dense<0.000000e+00> : vector<128xf32>
    %36 = vector.multi_reduction <add>, %35, %cst_11 [0] : vector<64x128xf32> to vector<128xf32>
    %37 = vector.shape_cast %36 : vector<128xf32> to vector<1x128xf32>
    %38 = vector.broadcast %1 : f32 to vector<1x128xf32>
    %39 = arith.addf %37, %38 : vector<1x128xf32>
    %c0_12 = arith.constant 0 : index
    %c0_13 = arith.constant 0 : index
    %c0_14 = arith.constant 0 : index
    %40 = vector.load %arg5[%c0_12, %c0_13, %c0_14] : memref<1x1x128xf32, #tpu.memory_space<vmem>>, vector<1x1x128xf32>
    %41 = vector.shape_cast %40 : vector<1x1x128xf32> to vector<1x128xf32>
    %42 = vector.shape_cast %39 : vector<1x128xf32> to vector<1x1x128xf32>
    tpu.vector_store %arg5[%c0_12, %c0_13, %c0_14], %42 {strides = array<i32>} : memref<1x1x128xf32, #tpu.memory_space<vmem>>, vector<1x1x128xf32>,
    return
  }
  func.func @transform_0(%arg0: i32) -> (i32, i32) {
    %c0_i32 = arith.constant 0 : i32
    %c0_i32_0 = arith.constant 0 : i32
    %c0_i32_1 = arith.constant 0 : i32
    return %c0_i32, %c0_i32_0 : i32, i32
  }
  func.func @transform_1(%arg0: i32) -> (i32, i32, i32) {
    %c0_i32 = arith.constant 0 : i32
    %c0_i32_0 = arith.constant 0 : i32
    %c0_i32_1 = arith.constant 0 : i32
    return %arg0, %c0_i32, %c0_i32_0 : i32, i32, i32
  }
  func.func @transform_2(%arg0: i32) -> (i32, i32) {
    %c0_i32 = arith.constant 0 : i32
    %c0_i32_0 = arith.constant 0 : i32
    %c0_i32_1 = arith.constant 0 : i32
    return %c0_i32, %c0_i32_0 : i32, i32
  }
  func.func @transform_3(%arg0: i32) -> (i32, i32) {
    %c0_i32 = arith.constant 0 : i32
    %c0_i32_0 = arith.constant 0 : i32
    %c0_i32_1 = arith.constant 0 : i32
    return %c0_i32, %c0_i32_0 : i32, i32
  }
  func.func @transform_4(%arg0: i32) -> (i32, i32, i32) {
    %c0_i32 = arith.constant 0 : i32
    %c0_i32_0 = arith.constant 0 : i32
    %c0_i32_1 = arith.constant 0 : i32
    return %arg0, %c0_i32, %c0_i32_0 : i32, i32, i32
  }
}

</mosaic_0001>

<bundles_post_ra>
// kernel: tpu_custom_call.1
= control target key start
LH: loop header
LB: loop body
LE: loop exit
PB: predicated region body
PF: predicated region fallthrough
CT: control target
= control target key end

     0   :  { %9 = vsyncpa [#allocation4], 0  ;;  %s916_s0 = inlined_call_operand.vmem [shape: f32[1,2], index: 0, kind: input, shape index: {}]   ;;  %s917_s1 = inlined_call_operand.vmem [shape: f32[1,1,128], index: 1, kind: input, shape index: {}]   ;;  %s918_s2 = inlined_call_operand.vmem [shape: f32[64,8], index: 2, kind: input, shape index: {}]   ;;  %s919_s3 = inlined_call_operand.vmem [shape: f32[64,64], index: 3, kind: input, shape index: {}]   ;;  %s920_s4 = inlined_call_operand.hbm [shape: f32[1,1,128], index: 4, kind: output, shape index: {}]  }
   0x1   :  { %10 = vsyncpa [#allocation3], 0  ;;  %s17_s17 = sshll.u32 %s916_s0, 4  ;;  %s18_s17 = int_to_ptr.vmem [resolvable:$true] %s17_s17 }
   0x2   :  { %s703_s18 = scalar_lea.vmem %s18_s17, 16  ;;  %p708_p1 = scmp.lt.s32.totalorder %s18_s17, %s18_s17 }
   0x3   :  { %p704_p0 = scmp.ne.s32.totalorder %s18_s17, %s703_s18  ;;  %p709_p2 = scmp.lt.s32.totalorder %s703_s18, %s703_s18 }
   0x5   :  { %p710_p3 = por %p709_p2, %p708_p1 }
   0x7   :  { %p711_p4 = pnand %p710_p3, %p704_p0 }
   0x9   :  { %714 = shalt.err (!%p711_p4)
}
   0xa   :  { %s739_s19 = smov [#allocation2]  }
   0xb   :  { %20 = dma.vmem_to_smem %s18_s17, 16, %s739_s19, [#allocation4]  }
   0xc   :  { %735 = dma.done.wait [#allocation4], 16  }
   0xd   :  { %736 = vsyncadd [#allocation4], 4294967280 }
   0xe   :  { %30 = sfence }
   0xf   :  { %v777_v0 = vld [vmem:[%s918_s2 + $0x38] sm:$0xff]  ;;  %v782_v1 = vld [vmem:[%s918_s2 + $0x28] sm:$0xff]  ;;  %s740_s23 = smov 127   ;;  %v789_v2 = vld [vmem:[%s918_s2 + $0x30] sm:$0xff]  ;;  %v741_v4 = vmov 0   ;;  %v742_v9 = vmov 1  }
  0x10   :  { %127 = vrot.lane.b32.xlu0 %v777_v0, %s740_s23  ;;  %123 = vrot.lane.b32.xlu1 %v782_v1, %s740_s23  ;;  %v794_v3 = vld [vmem:[%s918_s2 + $0x20] sm:$0xff]  ;;  %v801_v5 = vld [vmem:[%s918_s2 + $0x10] sm:$0xff]  ;;  %vm281_vm0 = vcmask 523264   ;;  %v743_v37 = vmov 3   ;;  %v744_v38 = vmov 4   ;;  %s745_s26 = smov [#allocation5]  }
  0x11   :  { %631 = vset.pattern.permute.xlu0 %v741_v4  ;;  %632 = vset.pattern.permute.xlu1 %v741_v4  ;;  %v806_v6 = vld [vmem:[%s918_s2 + $0x18] sm:$0xff]  ;;  %v813_v7 = vld [vmem:[%s918_s2] sm:$0xff]  ;;  %v818_v8 = vld [vmem:[%s918_s2 + $0x8] sm:$0xff]  ;;  %s31_s2 = sld [smem:[#allocation2]]  ;;  %s529_s27 = sshll.u32 %s745_s26, 4  ;;  %s530_s27 = int_to_ptr.vmem [resolvable:$true] %s529_s27 }
  0x12   :  { %v42_v35 = vld [vmem:[%s919_s3] sm:$0xff]  ;;  %s715_s28 = scalar_lea.vmem %s530_s27, 16  ;;  %s719_s29 = scalar_lea.vmem %s530_s27, 32 }
  0x13   :  { %v46_v36 = vld [vmem:[%s919_s3 + $0x20] sm:$0xff]  ;;  %596 = vmatprep.mubr.msk.f32.mxu0 %vm281_vm0, %v42_v35  ;;  %p716_p5 = scmp.ne.s32.totalorder %s530_s27, %s715_s28  ;;  %p720_p6 = scmp.lt.s32.totalorder %s530_s27, %s530_s27 }
  0x14   :  { %125 = vrot.lane.b32.xlu0 %v789_v2, %s740_s23  ;;  %121 = vrot.lane.b32.xlu1 %v794_v3, %s740_s23  ;;  %v539_v44 = vld [vmem:[%s917_s1] ss:$0 sm:$0xff]  ;;  %p721_p7 = scmp.lt.s32.totalorder %s719_s29, %s715_s28 }
  0x15   :  { %602 = vmatprep.mubr.msk.f32.mxu1 %vm281_vm0, %v46_v36 }
  0x16   :  { %p722_p8 = por %p721_p7, %p720_p6 }
  0x17   :  { %v104_v10 = vstv %s31_s2 }
  0x18   :  { %117 = vrot.lane.b32.xlu1 %v801_v5, %s740_s23  ;;  %119 = vrot.lane.b32.xlu0 %v806_v6, %s740_s23  ;;  %v112_v11 = vmul.f32 %v104_v10, %v777_v0  ;;  %v111_v15 = vmul.f32 %v104_v10, %v789_v2  ;;  %v110_v16 = vmul.f32 %v104_v10, %v782_v1  ;;  %p723_p9 = pnand %p722_p8, %p716_p5 }
  0x19   :  { %v109_v21 = vmul.f32 %v104_v10, %v794_v3  ;;  %v105_v23 = vmul.f32 %v104_v10, %v813_v7  ;;  %v108_v25 = vmul.f32 %v104_v10, %v806_v6  ;;  %v107_v29 = vmul.f32 %v104_v10, %v801_v5 }
  0x1a   :  { %v106_v32 = vmul.f32 %v104_v10, %v818_v8 }
  0x1c   :  { %113 = vrot.lane.b32.xlu1 %v813_v7, %s740_s23  ;;  %115 = vrot.lane.b32.xlu0 %v818_v8, %s740_s23 }
  0x20   :  { %87 = vperm.xlu0 %631, %v777_v0   ;;  %82 = vperm.xlu1 %632, %v789_v2  }
  0x24   :  { %77 = vperm.xlu0 %631, %v782_v1   ;;  %633 = vset.pattern.permute.xlu1 %v742_v9 }
  0x28   :  { %72 = vperm.xlu0 %631, %v794_v3  }
  0x2c   :  { %67 = vperm.xlu0 %631, %v806_v6  }
  0x30   :  { %62 = vperm.xlu0 %631, %v801_v5  }
  0x34   :  { %57 = vperm.xlu0 %631, %v818_v8  }
  0x38   :  { %52 = vperm.xlu0 %631, %v813_v7  }
  0x3c   :  { %634 = vset.pattern.permute.xlu0 %v742_v9 }
  0x82   :  { %v128_v12 = vpop.permute.xlu0 %127  ;;  %v124_v13 = vpop.permute.xlu1 %123 }
  0x83   :  { %v144_v14 = vadd.f32 %v128_v12, %v112_v11  ;;  %v142_v20 = vadd.f32 %v124_v13, %v110_v16 }
  0x85   :  { %182 = vperm.xlu1 %633, %v144_v14  }
  0x86   :  { %v126_v17 = vpop.permute.xlu0 %125  ;;  %v122_v18 = vpop.permute.xlu1 %121 }
  0x87   :  { %v143_v19 = vadd.f32 %v126_v17, %v111_v15  ;;  %v141_v24 = vadd.f32 %v122_v18, %v109_v21 }
  0x89   :  { %177 = vperm.xlu1 %633, %v143_v19  }
  0x8a   :  { %v118_v22 = vpop.permute.xlu1 %117  ;;  %v120_v27 = vpop.permute.xlu0 %119 }
  0x8b   :  { %v140_v30 = vadd.f32 %v120_v27, %v108_v25  ;;  %v139_v31 = vadd.f32 %v118_v22, %v107_v29 }
  0x8d   :  { %172 = vperm.xlu1 %633, %v142_v20  }
  0x8e   :  { %v114_v26 = vpop.permute.xlu1 %113  ;;  %v116_v33 = vpop.permute.xlu0 %115 }
  0x8f   :  { %v137_v28 = vadd.f32 %v114_v26, %v105_v23  ;;  %v138_v34 = vadd.f32 %v116_v33, %v106_v32 }
  0x91   :  { %167 = vperm.xlu1 %633, %v141_v24   ;;  %147 = vperm.xlu0 %634, %v137_v28  }
  0x95   :  { %162 = vperm.xlu1 %633, %v140_v30   ;;  %636 = vset.pattern.permute.xlu0 %v743_v37 }
  0x96   :  { %258 = vperm.xlu0 %636, %v801_v5  }
  0x99   :  { %157 = vperm.xlu1 %633, %v139_v31  }
  0x9a   :  { %270 = vperm.xlu0 %636, %v782_v1  }
  0x9b   :  { %v88_v39 = vpop.permute.xlu0 %87  ;;  %v83_v43 = vpop.permute.xlu1 %82 }
  0x9c   :  { %v103_v45 = vmul.f32 %v539_v44, %v88_v39  ;;  %v102_v50 = vmul.f32 %v539_v44, %v83_v43 }
  0x9d   :  { %152 = vperm.xlu1 %633, %v138_v34  }
  0x9e   :  { %278 = vperm.xlu0 %636, %v777_v0  }
  0x9f   :  { %v78_v40 = vpop.permute.xlu0 %77 }
  0xa0   :  { %v101_v54 = vmul.f32 %v539_v44, %v78_v40 }
  0xa1   :  { %635 = vset.pattern.permute.xlu1 %v743_v37 }
  0xa2   :  { %250 = vperm.xlu1 %635, %v813_v7   ;;  %638 = vset.pattern.permute.xlu0 %v744_v38 }
  0xa3   :  { %472 = vperm.xlu0 %638, %v818_v8   ;;  %v73_v41 = vpop.permute.xlu0 %72 }
  0xa4   :  { %v100_v59 = vmul.f32 %v539_v44, %v73_v41 }
  0xa6   :  { %254 = vperm.xlu1 %635, %v818_v8  }
  0xa7   :  { %484 = vperm.xlu0 %638, %v794_v3   ;;  %v68_v42 = vpop.permute.xlu0 %67 }
  0xaa   :  { %262 = vperm.xlu1 %635, %v806_v6  }
  0xab   :  { %492 = vperm.xlu0 %638, %v789_v2   ;;  %v63_v46 = vpop.permute.xlu0 %62 }
  0xae   :  { %266 = vperm.xlu1 %635, %v794_v3  }
  0xaf   :  { %v58_v49 = vpop.permute.xlu0 %57 }
  0xb0   :  { %v97_v14 = vmul.f32 %v539_v44, %v58_v49  ;;  %v47_v49 = vld [vmem:[%s919_s3 + $0x28] sm:$0xff] }
  0xb2   :  { %274 = vperm.xlu1 %635, %v789_v2  }
  0xb3   :  { %v53_v57 = vpop.permute.xlu0 %52 }
  0xb6   :  { %637 = vset.pattern.permute.xlu1 %v744_v38 }
  0xb7   :  { %468 = vperm.xlu1 %637, %v813_v7   ;;  %v98_v7 = vmul.f32 %v539_v44, %v63_v46 }
  0xbb   :  { %476 = vperm.xlu1 %637, %v801_v5  }
  0xbf   :  { %480 = vperm.xlu1 %637, %v806_v6  }
  0xc3   :  { %488 = vperm.xlu1 %637, %v782_v1   ;;  %v99_v1 = vmul.f32 %v539_v44, %v68_v42 }
  0xc7   :  { %496 = vperm.xlu1 %637, %v777_v0   ;;  %v96_v0 = vmul.f32 %v539_v44, %v53_v57 }
 0x100   :  { %v183_v47 = vpop.permute.xlu1 %182 }
 0x101   :  { %v192_v48 = vadd.f32 %v183_v47, %v103_v45 }
 0x103   :  { %v547_v51 = vmul.f32 -1.442695, %v192_v48 }
 0x104   :  { %v178_v52 = vpop.permute.xlu1 %177 }
 0x105   :  { %639 = vpow2.f32 %v547_v51  ;;  %v191_v53 = vadd.f32 %v178_v52, %v102_v50  ;;  %v44_v50 = vld [vmem:[%s919_s3 + $0x10] sm:$0xff]  ;;  %v45_v52 = vld [vmem:[%s919_s3 + $0x18] sm:$0xff] }
 0x106   :  { %v48_v51 = vld [vmem:[%s919_s3 + $0x30] sm:$0xff] }
 0x107   :  { %v546_v55 = vmul.f32 -1.442695, %v191_v53 }
 0x108   :  { %v173_v56 = vpop.permute.xlu1 %172 }
 0x109   :  { %641 = vpow2.f32 %v546_v55  ;;  %v190_v58 = vadd.f32 %v173_v56, %v101_v54 }
 0x10b   :  { %v545_v60 = vmul.f32 -1.442695, %v190_v58 }
 0x10c   :  { %v168_v61 = vpop.permute.xlu1 %167  ;;  %v148_v63 = vpop.permute.xlu0 %147 }
 0x10d   :  { %643 = vpow2.f32 %v545_v60  ;;  %v865_v62 = vadd.f32 %v168_v61, %v100_v59  ;;  %v868_v3 = vadd.f32 %v148_v63, %v96_v0 }
 0x10f   :  { %v544_v2 = vmul.f32 -1.442695, %v865_v62  ;;  %v540_v10 = vmul.f32 -1.442695, %v868_v3 }
 0x110   :  { %v163_v4 = vpop.permute.xlu1 %162 }
 0x111   :  { %645 = vpow2.f32 %v544_v2  ;;  %v870_v5 = vadd.f32 %v163_v4, %v99_v1  ;;  %v259_v56 = vpop.permute.xlu0 %258 }
 0x112   :  { %v640_v6 = vpop.eup %639 }
 0x113   :  { %v224_v8 = vadd.f32 1.0, %v640_v6  ;;  %v543_v9 = vmul.f32 -1.442695, %v870_v5 }
 0x114   :  { %v158_v11 = vpop.permute.xlu1 %157 }
 0x115   :  { %647 = vrcp.f32 %v224_v8  ;;  %v187_v12 = vadd.f32 %v158_v11, %v98_v7 }
 0x116   :  { %v642_v13 = vpop.eup %641  ;;  %649 = vpow2.f32 %v543_v9 }
 0x117   :  { %v223_v15 = vadd.f32 1.0, %v642_v13  ;;  %v542_v16 = vmul.f32 -1.442695, %v187_v12  ;;  %651 = vpow2.f32 %v540_v10 }
 0x118   :  { %v153_v17 = vpop.permute.xlu1 %152 }
 0x119   :  { %653 = vrcp.f32 %v223_v15  ;;  %v186_v18 = vadd.f32 %v153_v17, %v97_v14 }
 0x11a   :  { %v644_v19 = vpop.eup %643  ;;  %655 = vpow2.f32 %v542_v16 }
 0x11b   :  { %v222_v20 = vadd.f32 1.0, %v644_v19  ;;  %v541_v21 = vmul.f32 -1.442695, %v186_v18 }
 0x11d   :  { %657 = vrcp.f32 %v222_v20  ;;  %v251_v54 = vpop.permute.xlu1 %250 }
 0x11e   :  { %v646_v22 = vpop.eup %645  ;;  %659 = vpow2.f32 %v541_v21 }
 0x11f   :  { %v221_v23 = vadd.f32 1.0, %v646_v22 }
 0x121   :  { %661 = vrcp.f32 %v221_v23  ;;  %v255_v55 = vpop.permute.xlu1 %254 }
 0x122   :  { %v648_v24 = vpop.eup %647 }
 0x123   :  { %v650_v25 = vpop.eup %649  ;;  %v248_v26 = vmul.f32 %v648_v24, %v192_v48  ;;  %v43_v48 = vld [vmem:[%s919_s3 + $0x8] sm:$0xff] }
 0x124   :  { %v220_v27 = vadd.f32 1.0, %v650_v25  ;;  %v652_v28 = vpop.eup %651 }
 0x125   :  { %580 = vmatprep.subr.mxu0 %v248_v26  ;;  %608 = vmatprep.subr.mxu1 %v248_v26  ;;  %v217_v33 = vadd.f32 1.0, %v652_v28  ;;  %v263_v57 = vpop.permute.xlu1 %262 }
 0x126   :  { %v654_v29 = vpop.eup %653  ;;  %663 = vrcp.f32 %v220_v27  ;;  %581 = vmatpush3.msra.mxu0 %v248_v26  ;;  %616 = vmatpush3.msra.mxu1 %v248_v26 }
 0x127   :  { %v656_v30 = vpop.eup %655  ;;  %v247_v31 = vmul.f32 %v654_v29, %v191_v53  ;;  %v49_v53 = vld [vmem:[%s919_s3 + $0x38] sm:$0xff]  ;;  %s538_s3 = sld [smem:[#allocation2 + $0x1]] }
 0x128   :  { %v219_v32 = vadd.f32 1.0, %v656_v30 }
 0x129   :  { %582 = vmatprep.subr.mxu0 %v247_v31  ;;  %609 = vmatprep.subr.mxu1 %v247_v31  ;;  %v267_v59 = vpop.permute.xlu1 %266 }
 0x12a   :  { %v658_v34 = vpop.eup %657  ;;  %665 = vrcp.f32 %v219_v32  ;;  %583 = vmatpush3.msra.mxu0 %v247_v31  ;;  %617 = vmatpush3.msra.mxu1 %v247_v31 }
 0x12b   :  { %v660_v35 = vpop.eup %659  ;;  %v246_v36 = vmul.f32 %v658_v34, %v190_v58  ;;  %667 = vrcp.f32 %v217_v33  ;;  %v271_v58 = vpop.permute.xlu0 %270 }
 0x12c   :  { %v218_v37 = vadd.f32 1.0, %v660_v35 }
 0x12d   :  { %584 = vmatprep.subr.mxu0 %v246_v36  ;;  %610 = vmatprep.subr.mxu1 %v246_v36  ;;  %v275_v9 = vpop.permute.xlu1 %274 }
 0x12e   :  { %v662_v38 = vpop.eup %661  ;;  %669 = vrcp.f32 %v218_v37  ;;  %585 = vmatpush3.msra.mxu0 %v246_v36  ;;  %618 = vmatpush3.msra.mxu1 %v246_v36 }
 0x12f   :  { %v245_v39 = vmul.f32 %v662_v38, %v865_v62  ;;  %v279_v6 = vpop.permute.xlu0 %278 }
 0x131   :  { %586 = vmatprep.subr.mxu0 %v245_v39  ;;  %611 = vmatprep.subr.mxu1 %v245_v39 }
 0x132   :  { %587 = vmatpush3.msra.mxu0 %v245_v39  ;;  %619 = vmatpush3.msra.mxu1 %v245_v39  ;;  %v469_v37 = vpop.permute.xlu1 %468 }
 0x133   :  { %v664_v40 = vpop.eup %663 }
 0x134   :  { %v244_v41 = vmul.f32 %v664_v40, %v870_v5 }
 0x136   :  { %588 = vmatprep.subr.mxu0 %v244_v41  ;;  %612 = vmatprep.subr.mxu1 %v244_v41  ;;  %v477_v40 = vpop.permute.xlu1 %476 }
 0x137   :  { %v666_v42 = vpop.eup %665  ;;  %589 = vmatpush3.msra.mxu0 %v244_v41  ;;  %620 = vmatpush3.msra.mxu1 %v244_v41 }
 0x138   :  { %v243_v43 = vmul.f32 %v666_v42, %v187_v12  ;;  %v668_v44 = vpop.eup %667 }
 0x139   :  { %v241_v47 = vmul.f32 %v668_v44, %v868_v3 }
 0x13a   :  { %590 = vmatprep.subr.mxu0 %v243_v43  ;;  %613 = vmatprep.subr.mxu1 %v243_v43 }
 0x13b   :  { %v670_v45 = vpop.eup %669  ;;  %591 = vmatpush3.msra.mxu0 %v243_v43  ;;  %621 = vmatpush3.msra.mxu1 %v243_v43 }
 0x13c   :  { %v242_v46 = vmul.f32 %v670_v45, %v186_v18  ;;  %v473_v45 = vpop.permute.xlu0 %472 }
 0x13e   :  { %592 = vmatprep.subr.mxu0 %v242_v46  ;;  %614 = vmatprep.subr.mxu1 %v242_v46 }
 0x13f   :  { %593 = vmatpush3.msra.mxu0 %v242_v46  ;;  %622 = vmatpush3.msra.mxu1 %v242_v46 }
 0x140   :  { %594 = vmatprep.subr.mxu0 %v241_v47  ;;  %615 = vmatprep.subr.mxu1 %v241_v47 }
 0x141   :  { %595 = vmatpush3.msra.mxu0 %v241_v47  ;;  %623 = vmatpush3.msra.mxu1 %v241_v47 }
 0x142   :  { %597 = vmatmul.mubr.msk.f32.vlgmr.msra.gmra.mxu0 %vm281_vm0, %v43_v48  ;;  %603 = vmatmul.mubr.msk.f32.vlgmr.msra.gmra.mxu1 %vm281_vm0, %v47_v49  ;;  %v481_v49 = vpop.permute.xlu1 %480 }
 0x143   :  { %599 = vmatprep.mubr.msk.f32.mxu0 %vm281_vm0, %v44_v50  ;;  %605 = vmatprep.mubr.msk.f32.mxu1 %vm281_vm0, %v48_v51 }
 0x146   :  { %600 = vmatmul.mubr.msk.f32.gmra.mxu0 %vm281_vm0, %v45_v52  ;;  %606 = vmatmul.mubr.msk.f32.gmra.mxu1 %vm281_vm0, %v49_v53 }
 0x202   :  { %v598_v60 = vpop.f32.mrf.mxu0  ;;  %v604_v61 = vpop.f32.mrf.mxu1 }
 0x203   :  { %v378_v62 = vadd.f32 %v598_v60, %v255_v55  ;;  %v901_v63 = vadd.f32 %v604_v61, %v271_v58  ;;  %v485_v58 = vpop.permute.xlu0 %484 }
 0x204   :  { %v372_v0 = vpop.f32.mrf.mxu0  ;;  %v392_v1 = vpop.f32.mrf.mxu1 }
 0x205   :  { %v557_v2 = vmul.f32 -1.442695, %v378_v62  ;;  %v561_v3 = vmul.f32 -1.442695, %v901_v63  ;;  %v373_v4 = vadd.f32 %v372_v0, %v251_v54  ;;  %v904_v5 = vadd.f32 %v392_v1, %v267_v59  ;;  %v489_v0 = vpop.permute.xlu1 %488 }
 0x206   :  { %v601_v7 = vpop.f32.mrf.mxu0  ;;  %v607_v8 = vpop.f32.mrf.mxu1 }
 0x207   :  { %671 = vpow2.f32 %v557_v2  ;;  %v556_v10 = vmul.f32 -1.442695, %v373_v4  ;;  %v560_v11 = vmul.f32 -1.442695, %v904_v5  ;;  %v388_v12 = vadd.f32 %v601_v7, %v263_v57 }
 0x208   :  { %673 = vpow2.f32 %v561_v3  ;;  %v907_v13 = vadd.f32 %v607_v8, %v279_v6  ;;  %v382_v14 = vpop.f32.mrf.mxu0  ;;  %v402_v15 = vpop.f32.mrf.mxu1 }
 0x209   :  { %675 = vpow2.f32 %v556_v10  ;;  %v559_v16 = vmul.f32 -1.442695, %v388_v12  ;;  %v383_v17 = vadd.f32 %v382_v14, %v259_v56  ;;  %v403_v18 = vadd.f32 %v402_v15, %v275_v9  ;;  %v493_v8 = vpop.permute.xlu0 %492 }
 0x20a   :  { %677 = vpow2.f32 %v560_v11  ;;  %v563_v19 = vmul.f32 -1.442695, %v907_v13  ;;  %v497_v11 = vpop.permute.xlu1 %496 }
 0x20b   :  { %679 = vpow2.f32 %v559_v16  ;;  %v558_v20 = vmul.f32 -1.442695, %v383_v17  ;;  %v562_v21 = vmul.f32 -1.442695, %v403_v18 }
 0x20d   :  { %681 = vpow2.f32 %v558_v20  ;;  %v520_v20 = vstv %s538_s3 }
 0x20e   :  { %683 = vpow2.f32 %v562_v21 }
 0x20f   :  { %685 = vpow2.f32 %v563_v19 }
 0x214   :  { %v672_v22 = vpop.eup %671 }
 0x215   :  { %v674_v23 = vpop.eup %673  ;;  %v436_v24 = vadd.f32 1.0, %v672_v22 }
 0x216   :  { %v676_v25 = vpop.eup %675  ;;  %v440_v33 = vadd.f32 1.0, %v674_v23 }
 0x217   :  { %v678_v26 = vpop.eup %677  ;;  %687 = vrcp.f32 %v436_v24  ;;  %v435_v27 = vadd.f32 1.0, %v676_v25 }
 0x218   :  { %v680_v28 = vpop.eup %679  ;;  %v439_v29 = vadd.f32 1.0, %v678_v26 }
 0x219   :  { %689 = vrcp.f32 %v435_v27  ;;  %v438_v30 = vadd.f32 1.0, %v680_v28 }
 0x21a   :  { %v682_v31 = vpop.eup %681 }
 0x21b   :  { %v684_v32 = vpop.eup %683  ;;  %691 = vrcp.f32 %v438_v30  ;;  %v437_v34 = vadd.f32 1.0, %v682_v31 }
 0x21c   :  { %v686_v35 = vpop.eup %685  ;;  %693 = vrcp.f32 %v439_v29  ;;  %v441_v36 = vadd.f32 1.0, %v684_v32 }
 0x21d   :  { %695 = vrcp.f32 %v437_v34  ;;  %v442_v38 = vadd.f32 1.0, %v686_v35 }
 0x21e   :  { %697 = vrcp.f32 %v440_v33 }
 0x21f   :  { %699 = vrcp.f32 %v441_v36 }
 0x220   :  { %701 = vrcp.f32 %v442_v38 }
 0x224   :  { %v688_v39 = vpop.eup %687 }
 0x225   :  { %v460_v43 = vmul.f32 %v688_v39, %v378_v62 }
 0x226   :  { %v690_v41 = vpop.eup %689 }
 0x227   :  { %v459_v42 = vmul.f32 %v690_v41, %v373_v4  ;;  %v500_v52 = vmul.f32 %v473_v45, %v460_v43 }
 0x228   :  { %v692_v44 = vpop.eup %691 }
 0x229   :  { %v694_v46 = vpop.eup %693  ;;  %v499_v47 = vmul.f32 %v469_v37, %v459_v42  ;;  %v462_v51 = vmul.f32 %v692_v44, %v388_v12 }
 0x22a   :  { %v696_v48 = vpop.eup %695  ;;  %v463_v56 = vmul.f32 %v694_v46, %v904_v5 }
 0x22b   :  { %v461_v50 = vmul.f32 %v696_v48, %v383_v17  ;;  %v698_v53 = vpop.eup %697  ;;  %v507_v55 = vadd.f32 %v500_v52, %v499_v47  ;;  %v502_v59 = vmul.f32 %v481_v49, %v462_v51 }
 0x22c   :  { %v700_v57 = vpop.eup %699  ;;  %v464_v60 = vmul.f32 %v698_v53, %v901_v63  ;;  %v503_v2 = vmul.f32 %v485_v58, %v463_v56 }
 0x22d   :  { %v501_v54 = vmul.f32 %v477_v40, %v461_v50  ;;  %v702_v62 = vpop.eup %701  ;;  %v465_v3 = vmul.f32 %v700_v57, %v403_v18 }
 0x22e   :  { %v504_v4 = vmul.f32 %v489_v0, %v464_v60  ;;  %v466_v6 = vmul.f32 %v702_v62, %v907_v13 }
 0x22f   :  { %v508_v61 = vadd.f32 %v507_v55, %v501_v54  ;;  %v505_v10 = vmul.f32 %v493_v8, %v465_v3 }
 0x230   :  { %v506_v5 = vmul.f32 %v497_v11, %v466_v6 }
 0x231   :  { %v509_v1 = vadd.f32 %v508_v61, %v502_v59 }
 0x233   :  { %v510_v7 = vadd.f32 %v509_v1, %v503_v2 }
 0x235   :  { %v511_v9 = vadd.f32 %v510_v7, %v504_v4 }
 0x237   :  { %v512_v12 = vadd.f32 %v511_v9, %v505_v10 }
 0x239   :  { %v513_v14 = vadd.f32 %v512_v12, %v506_v5 }
 0x23b   :  { %v514_v15 = vrot.slane %v513_v14, 4 }
 0x23d   :  { %v515_v63 = vadd.f32 %v514_v15, %v513_v14 }
 0x23f   :  { %v516_v16 = vrot.slane %v515_v63, 2 }
 0x241   :  { %v517_v17 = vadd.f32 %v516_v16, %v515_v63 }
 0x243   :  { %v518_v19 = vrot.slane %v517_v17, 1 }
 0x245   :  { %v519_v18 = vadd.f32 %v518_v19, %v517_v17 }
 0x247   :  { %v521_v21 = vadd.f32 %v520_v20, %v519_v18 }
 0x249   :  { %522 = vst [vmem:[#allocation5] sm:$0x1] %v521_v21 }
 0x24a   :  { %726 = shalt.err (!%p723_p9)
}
 0x24b   :  { %532 = dma.vmem_to_hbm [thread:$0]  %s530_s27, 16, %s920_s4, [#allocation3]  }
 0x24c   :  { %737 = dma.done.wait [#allocation3], 16  }
 0x24d   :  { %738 = vsyncadd [#allocation3], 4294967280 }
 0x24e   :  { %536 = vsyncpa [#allocation3], 1 }
 0x24f   :  { %537 = vsyncpa [#allocation4], 1 }

</bundles_post_ra>
